<compile_context>
chip_gen: v6e
topology: v6e:2x2x1
jax: 0.10.0
libtpu: 0.0.40
codegen_flags: <defaults>
</compile_context>

<pallas_src>
import functools

import jax
import jax.numpy as jnp
from jax.experimental import pallas as pl
from jax.experimental.pallas import tpu as pltpu

_LANE = 128      # f32 lane width
_SUBLANE = 8     # f32 sublane height
_NEG_INF = -1e30


def _round_up(x, m):
    return (x + m - 1) // m * m


def _vmem_capacity_bytes():
    try:
        return int(pltpu.get_tpu_info().vmem_capacity_bytes)
    except Exception:
        return 64 << 20  # conservative: v7x per-TC physical VMEM


def _fused_mlp_kernel(x_ref, *refs, n_layers, compute_dtype, approx_softmax):
    """refs = (w_1, b_1, ..., w_n, b_n, out_ref). All tiles resident in VMEM."""
    o_ref = refs[-1]
    h = x_ref[...]                                    # (TB, F0_pad), compute_dtype
    for i in range(n_layers):
        w = refs[2 * i][...]                          # (Fin_pad, Fout_pad) compute_dtype
        b = refs[2 * i + 1][...]                      # (1, Fout_pad) f32
        # NOTE: bias MUST stay f32 and be added AFTER the f32-accumulated matmul.
        # The -1e30 padded-class trick (softmax padding) depends on it; do NOT
        # fold the bias into compute_dtype or into the matmul operand.
        y = jnp.dot(h, w, preferred_element_type=jnp.float32) + b
        if i < n_layers - 1:
            # ReLU in f32 (safe on v5e: no bf16 VALU), single cast for next MXU op.
            h = jnp.maximum(y, 0.0).astype(compute_dtype)
        else:
            # Padded classes carry a -1e30 bias -> exp() == 0 -> excluded from the
            # normalization; real classes dominate the row max.
            m = jnp.max(y, axis=1, keepdims=True)
            e = jnp.exp(y - m)
            denom = jnp.sum(e, axis=1, keepdims=True)
            if approx_softmax:
                h = e * pl.reciprocal(denom, approx=True)   # EUP slot, ~1e-3 rel err
            else:
                h = e / denom                               # exact probabilities
    o_ref[...] = h.astype(o_ref.dtype)


def prepare_params(params, compute_dtype=jnp.bfloat16):
    """One-time lane-padding + low-precision cast of all weights/biases.

    Call ONCE per model, not per forward: doing it per call reads every f32
    weight from HBM and writes a padded bf16 copy back before the kernel runs.
    """
    n_layers = len(params)
    dims = [params[0][0].shape[0]] + [w.shape[1] for w, _ in params]
    dims_pad = [_round_up(d, _LANE) for d in dims]
    layers = []
    for li, (w, b) in enumerate(params):
        fi, fo = dims[li], dims[li + 1]
        fip, fop = dims_pad[li], dims_pad[li + 1]
        w_p = (jnp.zeros((fip, fop), jnp.float32).at[:fi, :fo].set(w)
               ).astype(compute_dtype)
        # Hidden layers: padded lanes get 0 bias (stay 0 through ReLU).
        # Final layer: padded lanes get -1e30 so softmax ignores them.
        pad_bias = 0.0 if li < n_layers - 1 else _NEG_INF
        b_p = jnp.full((1, fop), pad_bias, jnp.float32).at[0, :fo].set(b)
        layers.append((w_p, b_p))
    return {
        "layers": tuple(layers),
        "dims": tuple(dims),
        "dims_pad": tuple(dims_pad),
        "compute_dtype": compute_dtype,
    }


def _build_specs(dims_pad, tb, n_layers, single_buffer_weights):
    in_specs = [pl.BlockSpec((tb, dims_pad[0]), lambda i: (i, 0))]
    res_kw = {}
    if single_buffer_weights:
        # Constant block index -> the default second pipeline buffer is pure waste.
        res_kw = dict(pipeline_mode=pl.Buffered(1))
    for li in range(n_layers):
        fip, fop = dims_pad[li], dims_pad[li + 1]
        in_specs.append(pl.BlockSpec((fip, fop), lambda i: (0, 0), **res_kw))  # weights
        in_specs.append(pl.BlockSpec((1, fop), lambda i: (0, 0), **res_kw))    # bias
    out_spec = pl.BlockSpec((tb, dims_pad[-1]), lambda i: (i, 0))
    return in_specs, out_spec


def classifier_forward(x, prepared, *, batch_tile=512, approx_softmax=False):
    """Fused forward pass.

    x:        (B, Fin) float32 (or bf16)
    prepared: output of prepare_params()
    Returns   (B, num_classes) float32 softmax probabilities.
    """
    layers = prepared["layers"]
    dims = prepared["dims"]
    dims_pad = prepared["dims_pad"]
    compute_dtype = prepared["compute_dtype"]
    n_layers = len(layers)
    B, F0 = x.shape
    assert F0 == dims[0], (F0, dims[0])

    itemsize_c = jnp.dtype(compute_dtype).itemsize
    weight_bytes = sum(int(w.size) * w.dtype.itemsize + int(b.size) * b.dtype.itemsize
                       for w, b in layers)

    # ---- VMEM budget -> batch tile & explicit vmem limit --------------------
    cap = _vmem_capacity_bytes()
    budget = int(cap * 0.8)
    max_dim = max(dims_pad)

    def _tile_bytes(t):
        in_t = 2 * t * dims_pad[0] * itemsize_c       # double-buffered bf16 input tile
        out_t = 2 * t * dims_pad[-1] * 4              # double-buffered f32 output tile
        act = 3 * t * max_dim * 4                     # live f32 intermediates (rough)
        return in_t + out_t + act

    if weight_bytes > budget:
        # TODO(synk): stream weights layer-by-layer (memory_space=pl.ANY +
        # make_async_copy double-buffering, overlapping layer-i compute with
        # layer-(i+1) weight DMA) when the padded model exceeds VMEM — most
        # relevant on v7x (64 MiB/TC). All-resident design only for now.
        raise ValueError("padded weights exceed the VMEM budget for the "
                         "all-resident fused kernel")

    tb = min(_round_up(B, _SUBLANE), _round_up(batch_tile, _SUBLANE))
    while tb > _SUBLANE and weight_bytes + _tile_bytes(tb) > budget:
        tb = max(_round_up(tb // 2, _SUBLANE), _SUBLANE)
    b_pad = _round_up(B, tb)

    # Scoped VMEM limit: resident weights (x2 in case single-buffering is
    # unavailable) + tiles + headroom, clamped to physical capacity.
    needed = 2 * weight_bytes + _tile_bytes(tb)
    vmem_limit = min(cap, max(int(needed * 1.25), 32 << 20))

    # ---- inputs (only x is padded per call; weights are pre-prepared) -------
    # Pad x directly in compute_dtype: halves input DMA / VMEM vs f32.
    x_p = jnp.zeros((b_pad, dims_pad[0]), compute_dtype).at[:B, :F0].set(
        x.astype(compute_dtype))
    flat_inputs = [x_p]
    for w_p, b_p in layers:
        flat_inputs += [w_p, b_p]

    flops = 2 * b_pad * sum(dims_pad[i] * dims_pad[i + 1] for i in range(n_layers))
    bytes_accessed = (int(x_p.size) * itemsize_c
                      + weight_bytes
                      + b_pad * dims_pad[-1] * 4)
    cost = pl.CostEstimate(flops=flops,
                           transcendentals=b_pad * dims_pad[-1],
                           bytes_accessed=bytes_accessed)

    kernel = functools.partial(_fused_mlp_kernel, n_layers=n_layers,
                               compute_dtype=compute_dtype,
                               approx_softmax=approx_softmax)

    last_err = None
    for single_buffer in (True, False):     # fall back if Buffered(1) unsupported
        try:
            in_specs, out_spec = _build_specs(dims_pad, tb, n_layers, single_buffer)
            out_p = pl.pallas_call(
                kernel,
                out_shape=jax.ShapeDtypeStruct((b_pad, dims_pad[-1]), jnp.float32),
                grid=(b_pad // tb,),
                in_specs=in_specs,
                out_specs=out_spec,
                compiler_params=pltpu.CompilerParams(
                    dimension_semantics=("parallel",),   # batch tiles shard across TCs
                    vmem_limit_bytes=vmem_limit,
                ),
                cost_estimate=cost,
            )(*flat_inputs)
            return out_p[:B, :dims[-1]]
        except Exception as e:
            last_err = e
    raise last_err


def init_params(key, hidden_sizes):
    """Deterministic PyTorch-style (uniform +/- 1/sqrt(fan_in)) init."""
    params = []
    for i in range(len(hidden_sizes) - 1):
        fan_in, fan_out = hidden_sizes[i], hidden_sizes[i + 1]
        key, kw, kb = jax.random.split(key, 3)
        bound = 1.0 / (fan_in ** 0.5)
        # Stored already transposed: (fan_in, fan_out), equivalent to W.T
        w = jax.random.uniform(kw, (fan_in, fan_out), jnp.float32, -bound, bound)
        bias = jax.random.uniform(kb, (fan_out,), jnp.float32, -bound, bound)
        params.append((w, bias))
    return params


def reference_forward(x, params):
    """Pure-JAX float32 reference matching the PyTorch nn.Sequential."""
    h = x
    n = len(params)
    for i, (w, b) in enumerate(params):
        y = h @ w + b
        h = jnp.maximum(y, 0.0) if i < n - 1 else jax.nn.softmax(y, axis=1)
    return h


if __name__ == "__main__":
    # ClassificationOptions.hidden_sizes: [in_dim, hidden..., num_classes]
    hidden_sizes = [32, 64, 16, 8]
    batch = 2

    key = jax.random.PRNGKey(0)
    key, kx = jax.random.split(key)
    x = jax.random.normal(kx, (batch, hidden_sizes[0]), jnp.float32)
    params = init_params(key, hidden_sizes)

    prepared = prepare_params(params)          # one-time pad + bf16 cast
    out = classifier_forward(x, prepared)
    out = jax.block_until_ready(out)

    assert out.shape == (batch, hidden_sizes[-1])

    # Softmax rows must sum to 1 (exact divide -> tight tolerance).
    row_sums = jnp.sum(out, axis=1)
    assert bool(jnp.allclose(row_sums, jnp.ones_like(row_sums), atol=1e-3)), row_sums

    # Match the f32 reference within bf16-matmul tolerance.
    ref = reference_forward(x, params)
    assert bool(jnp.allclose(out, ref, atol=5e-2)), jnp.max(jnp.abs(out - ref))

    print("KERNEL_OK")
</pallas_src>

<mosaic_0001>
module attributes {stable_mosaic.version = 11 : i64} {
  func.func @_fused_mlp_kernel(%arg0: i32, %arg1: memref<8x128xbf16, #tpu.memory_space<vmem>>, %arg2: memref<128x128xbf16, #tpu.memory_space<vmem>>, %arg3: memref<1x128xf32, #tpu.memory_space<vmem>>, %arg4: memref<128x128xbf16, #tpu.memory_space<vmem>>, %arg5: memref<1x128xf32, #tpu.memory_space<vmem>>, %arg6: memref<128x128xbf16, #tpu.memory_space<vmem>>, %arg7: memref<1x128xf32, #tpu.memory_space<vmem>>, %arg8: memref<8x128xf32, #tpu.memory_space<vmem>>) attributes {dimension_semantics = [#tpu.dimension_semantics<parallel>], iteration_bounds = array<i64: 1>, scalar_prefetch = 0 : i64, scratch_operands = 0 : i64, tpu.core_type = #tpu.core_type<tc>, window_params = [{transform_indices = @transform_0, window_bounds = array<i64: 8, 128>}, {pipeline_mode = #tpu.pipeline_mode<synchronous>, transform_indices = @transform_1, window_bounds = array<i64: 128, 128>}, {pipeline_mode = #tpu.pipeline_mode<synchronous>, transform_indices = @transform_2, window_bounds = array<i64: 1, 128>}, {pipeline_mode = #tpu.pipeline_mode<synchronous>, transform_indices = @transform_3, window_bounds = array<i64: 128, 128>}, {pipeline_mode = #tpu.pipeline_mode<synchronous>, transform_indices = @transform_4, window_bounds = array<i64: 1, 128>}, {pipeline_mode = #tpu.pipeline_mode<synchronous>, transform_indices = @transform_5, window_bounds = array<i64: 128, 128>}, {pipeline_mode = #tpu.pipeline_mode<synchronous>, transform_indices = @transform_6, window_bounds = array<i64: 1, 128>}, {transform_indices = @transform_7, window_bounds = array<i64: 8, 128>}]} {
    %c0 = arith.constant 0 : index
    %c0_0 = arith.constant 0 : index
    %0 = vector.load %arg1[%c0, %c0_0] : memref<8x128xbf16, #tpu.memory_space<vmem>>, vector<8x128xbf16>
    %c0_1 = arith.constant 0 : index
    %c0_2 = arith.constant 0 : index
    %1 = vector.load %arg2[%c0_1, %c0_2] : memref<128x128xbf16, #tpu.memory_space<vmem>>, vector<128x128xbf16>
    %c0_3 = arith.constant 0 : index
    %c0_4 = arith.constant 0 : index
    %2 = vector.load %arg3[%c0_3, %c0_4] : memref<1x128xf32, #tpu.memory_space<vmem>>, vector<1x128xf32>
    %cst = arith.constant dense<0.000000e+00> : vector<8x128xf32>
    %3 = tpu.matmul %0, %1, %cst {dimension_numbers = #tpu.dot_dimension_numbers<[1], [0], [0], [1], [0, 0, 1, 1], [], []>} : vector<8x128xbf16>, vector<128x128xbf16>, vector<8x128xf32> -> vector<8x128xf32>
    %4 = vector.broadcast %2 : vector<1x128xf32> to vector<8x128xf32>
    %5 = arith.addf %3, %4 : vector<8x128xf32>
    %cst_5 = arith.constant 0.000000e+00 : f32
    %6 = vector.broadcast %cst_5 : f32 to vector<8x128xf32>
    %7 = arith.maximumf %5, %6 : vector<8x128xf32>
    %8 = arith.truncf %7 : vector<8x128xf32> to vector<8x128xbf16>
    %c0_6 = arith.constant 0 : index
    %c0_7 = arith.constant 0 : index
    %9 = vector.load %arg4[%c0_6, %c0_7] : memref<128x128xbf16, #tpu.memory_space<vmem>>, vector<128x128xbf16>
    %c0_8 = arith.constant 0 : index
    %c0_9 = arith.constant 0 : index
    %10 = vector.load %arg5[%c0_8, %c0_9] : memref<1x128xf32, #tpu.memory_space<vmem>>, vector<1x128xf32>
    %cst_10 = arith.constant dense<0.000000e+00> : vector<8x128xf32>
    %11 = tpu.matmul %8, %9, %cst_10 {dimension_numbers = #tpu.dot_dimension_numbers<[1], [0], [0], [1], [0, 0, 1, 1], [], []>} : vector<8x128xbf16>, vector<128x128xbf16>, vector<8x128xf32> -> vector<8x128xf32>
    %12 = vector.broadcast %10 : vector<1x128xf32> to vector<8x128xf32>
    %13 = arith.addf %11, %12 : vector<8x128xf32>
    %cst_11 = arith.constant 0.000000e+00 : f32
    %14 = vector.broadcast %cst_11 : f32 to vector<8x128xf32>
    %15 = arith.maximumf %13, %14 : vector<8x128xf32>
    %16 = arith.truncf %15 : vector<8x128xf32> to vector<8x128xbf16>
    %c0_12 = arith.constant 0 : index
    %c0_13 = arith.constant 0 : index
    %17 = vector.load %arg6[%c0_12, %c0_13] : memref<128x128xbf16, #tpu.memory_space<vmem>>, vector<128x128xbf16>
    %c0_14 = arith.constant 0 : index
    %c0_15 = arith.constant 0 : index
    %18 = vector.load %arg7[%c0_14, %c0_15] : memref<1x128xf32, #tpu.memory_space<vmem>>, vector<1x128xf32>
    %cst_16 = arith.constant dense<0.000000e+00> : vector<8x128xf32>
    %19 = tpu.matmul %16, %17, %cst_16 {dimension_numbers = #tpu.dot_dimension_numbers<[1], [0], [0], [1], [0, 0, 1, 1], [], []>} : vector<8x128xbf16>, vector<128x128xbf16>, vector<8x128xf32> -> vector<8x128xf32>
    %20 = vector.broadcast %18 : vector<1x128xf32> to vector<8x128xf32>
    %21 = arith.addf %19, %20 : vector<8x128xf32>
    %cst_17 = arith.constant dense<0xFF800000> : vector<8xf32>
    %22 = vector.multi_reduction <maximumf>, %21, %cst_17 [1] : vector<8x128xf32> to vector<8xf32>
    %23 = vector.shape_cast %22 : vector<8xf32> to vector<8x1xf32>
    %24 = vector.broadcast %23 : vector<8x1xf32> to vector<8x128xf32>
    %25 = arith.subf %21, %24 : vector<8x128xf32>
    %26 = math.exp %25 : vector<8x128xf32>
    %cst_18 = arith.constant dense<0.000000e+00> : vector<8xf32>
    %27 = vector.multi_reduction <add>, %26, %cst_18 [1] : vector<8x128xf32> to vector<8xf32>
    %28 = vector.shape_cast %27 : vector<8xf32> to vector<8x1xf32>
    %29 = vector.broadcast %28 : vector<8x1xf32> to vector<8x128xf32>
    %30 = arith.divf %26, %29 : vector<8x128xf32>
    %c0_19 = arith.constant 0 : index
    %c0_20 = arith.constant 0 : index
    %31 = vector.load %arg8[%c0_19, %c0_20] : memref<8x128xf32, #tpu.memory_space<vmem>>, vector<8x128xf32>
    tpu.vector_store %arg8[%c0_19, %c0_20], %30 {strides = array<i32>} : memref<8x128xf32, #tpu.memory_space<vmem>>, vector<8x128xf32>,
    return
  }
  func.func @transform_0(%arg0: i32) -> (i32, i32) {
    %c0_i32 = arith.constant 0 : i32
    %c0_i32_0 = arith.constant 0 : i32
    return %arg0, %c0_i32 : i32, i32
  }
  func.func @transform_1(%arg0: i32) -> (i32, i32) {
    %c0_i32 = arith.constant 0 : i32
    %c0_i32_0 = arith.constant 0 : i32
    %c0_i32_1 = arith.constant 0 : i32
    return %c0_i32, %c0_i32_0 : i32, i32
  }
  func.func @transform_2(%arg0: i32) -> (i32, i32) {
    %c0_i32 = arith.constant 0 : i32
    %c0_i32_0 = arith.constant 0 : i32
    %c0_i32_1 = arith.constant 0 : i32
    return %c0_i32, %c0_i32_0 : i32, i32
  }
  func.func @transform_3(%arg0: i32) -> (i32, i32) {
    %c0_i32 = arith.constant 0 : i32
    %c0_i32_0 = arith.constant 0 : i32
    %c0_i32_1 = arith.constant 0 : i32
    return %c0_i32, %c0_i32_0 : i32, i32
  }
  func.func @transform_4(%arg0: i32) -> (i32, i32) {
    %c0_i32 = arith.constant 0 : i32
    %c0_i32_0 = arith.constant 0 : i32
    %c0_i32_1 = arith.constant 0 : i32
    return %c0_i32, %c0_i32_0 : i32, i32
  }
  func.func @transform_5(%arg0: i32) -> (i32, i32) {
    %c0_i32 = arith.constant 0 : i32
    %c0_i32_0 = arith.constant 0 : i32
    %c0_i32_1 = arith.constant 0 : i32
    return %c0_i32, %c0_i32_0 : i32, i32
  }
  func.func @transform_6(%arg0: i32) -> (i32, i32) {
    %c0_i32 = arith.constant 0 : i32
    %c0_i32_0 = arith.constant 0 : i32
    %c0_i32_1 = arith.constant 0 : i32
    return %c0_i32, %c0_i32_0 : i32, i32
  }
  func.func @transform_7(%arg0: i32) -> (i32, i32) {
    %c0_i32 = arith.constant 0 : i32
    %c0_i32_0 = arith.constant 0 : i32
    return %arg0, %c0_i32 : i32, i32
  }
}

module attributes {stable_mosaic.version = 11 : i64} {
  func.func @_fused_mlp_kernel(%arg0: i32, %arg1: memref<8x128xbf16, #tpu.memory_space<vmem>>, %arg2: memref<128x128xbf16, #tpu.memory_space<vmem>>, %arg3: memref<1x128xf32, #tpu.memory_space<vmem>>, %arg4: memref<128x128xbf16, #tpu.memory_space<vmem>>, %arg5: memref<1x128xf32, #tpu.memory_space<vmem>>, %arg6: memref<128x128xbf16, #tpu.memory_space<vmem>>, %arg7: memref<1x128xf32, #tpu.memory_space<vmem>>, %arg8: memref<8x128xf32, #tpu.memory_space<vmem>>) attributes {dimension_semantics = [#tpu.dimension_semantics<parallel>], iteration_bounds = array<i64: 1>, scalar_prefetch = 0 : i64, scratch_operands = 0 : i64, tpu.core_type = #tpu.core_type<tc>, window_params = [{transform_indices = @transform_0, window_bounds = array<i64: 8, 128>}, {pipeline_mode = #tpu.pipeline_mode<synchronous>, transform_indices = @transform_1, window_bounds = array<i64: 128, 128>}, {pipeline_mode = #tpu.pipeline_mode<synchronous>, transform_indices = @transform_2, window_bounds = array<i64: 1, 128>}, {pipeline_mode = #tpu.pipeline_mode<synchronous>, transform_indices = @transform_3, window_bounds = array<i64: 128, 128>}, {pipeline_mode = #tpu.pipeline_mode<synchronous>, transform_indices = @transform_4, window_bounds = array<i64: 1, 128>}, {pipeline_mode = #tpu.pipeline_mode<synchronous>, transform_indices = @transform_5, window_bounds = array<i64: 128, 128>}, {pipeline_mode = #tpu.pipeline_mode<synchronous>, transform_indices = @transform_6, window_bounds = array<i64: 1, 128>}, {transform_indices = @transform_7, window_bounds = array<i64: 8, 128>}]} {
    %c0 = arith.constant 0 : index
    %c0_0 = arith.constant 0 : index
    %0 = vector.load %arg1[%c0, %c0_0] : memref<8x128xbf16, #tpu.memory_space<vmem>>, vector<8x128xbf16>
    %c0_1 = arith.constant 0 : index
    %c0_2 = arith.constant 0 : index
    %1 = vector.load %arg2[%c0_1, %c0_2] : memref<128x128xbf16, #tpu.memory_space<vmem>>, vector<128x128xbf16>
    %c0_3 = arith.constant 0 : index
    %c0_4 = arith.constant 0 : index
    %2 = vector.load %arg3[%c0_3, %c0_4] : memref<1x128xf32, #tpu.memory_space<vmem>>, vector<1x128xf32>
    %cst = arith.constant dense<0.000000e+00> : vector<8x128xf32>
    %3 = tpu.matmul %0, %1, %cst {dimension_numbers = #tpu.dot_dimension_numbers<[1], [0], [0], [1], [0, 0, 1, 1], [], []>} : vector<8x128xbf16>, vector<128x128xbf16>, vector<8x128xf32> -> vector<8x128xf32>
    %4 = vector.broadcast %2 : vector<1x128xf32> to vector<8x128xf32>
    %5 = arith.addf %3, %4 : vector<8x128xf32>
    %cst_5 = arith.constant 0.000000e+00 : f32
    %6 = vector.broadcast %cst_5 : f32 to vector<8x128xf32>
    %7 = arith.maximumf %5, %6 : vector<8x128xf32>
    %8 = arith.truncf %7 : vector<8x128xf32> to vector<8x128xbf16>
    %c0_6 = arith.constant 0 : index
    %c0_7 = arith.constant 0 : index
    %9 = vector.load %arg4[%c0_6, %c0_7] : memref<128x128xbf16, #tpu.memory_space<vmem>>, vector<128x128xbf16>
    %c0_8 = arith.constant 0 : index
    %c0_9 = arith.constant 0 : index
    %10 = vector.load %arg5[%c0_8, %c0_9] : memref<1x128xf32, #tpu.memory_space<vmem>>, vector<1x128xf32>
    %cst_10 = arith.constant dense<0.000000e+00> : vector<8x128xf32>
    %11 = tpu.matmul %8, %9, %cst_10 {dimension_numbers = #tpu.dot_dimension_numbers<[1], [0], [0], [1], [0, 0, 1, 1], [], []>} : vector<8x128xbf16>, vector<128x128xbf16>, vector<8x128xf32> -> vector<8x128xf32>
    %12 = vector.broadcast %10 : vector<1x128xf32> to vector<8x128xf32>
    %13 = arith.addf %11, %12 : vector<8x128xf32>
    %cst_11 = arith.constant 0.000000e+00 : f32
    %14 = vector.broadcast %cst_11 : f32 to vector<8x128xf32>
    %15 = arith.maximumf %13, %14 : vector<8x128xf32>
    %16 = arith.truncf %15 : vector<8x128xf32> to vector<8x128xbf16>
    %c0_12 = arith.constant 0 : index
    %c0_13 = arith.constant 0 : index
    %17 = vector.load %arg6[%c0_12, %c0_13] : memref<128x128xbf16, #tpu.memory_space<vmem>>, vector<128x128xbf16>
    %c0_14 = arith.constant 0 : index
    %c0_15 = arith.constant 0 : index
    %18 = vector.load %arg7[%c0_14, %c0_15] : memref<1x128xf32, #tpu.memory_space<vmem>>, vector<1x128xf32>
    %cst_16 = arith.constant dense<0.000000e+00> : vector<8x128xf32>
    %19 = tpu.matmul %16, %17, %cst_16 {dimension_numbers = #tpu.dot_dimension_numbers<[1], [0], [0], [1], [0, 0, 1, 1], [], []>} : vector<8x128xbf16>, vector<128x128xbf16>, vector<8x128xf32> -> vector<8x128xf32>
    %20 = vector.broadcast %18 : vector<1x128xf32> to vector<8x128xf32>
    %21 = arith.addf %19, %20 : vector<8x128xf32>
    %cst_17 = arith.constant dense<0xFF800000> : vector<8xf32>
    %22 = vector.multi_reduction <maximumf>, %21, %cst_17 [1] : vector<8x128xf32> to vector<8xf32>
    %23 = vector.shape_cast %22 : vector<8xf32> to vector<8x1xf32>
    %24 = vector.broadcast %23 : vector<8x1xf32> to vector<8x128xf32>
    %25 = arith.subf %21, %24 : vector<8x128xf32>
    %26 = math.exp %25 : vector<8x128xf32>
    %cst_18 = arith.constant dense<0.000000e+00> : vector<8xf32>
    %27 = vector.multi_reduction <add>, %26, %cst_18 [1] : vector<8x128xf32> to vector<8xf32>
    %28 = vector.shape_cast %27 : vector<8xf32> to vector<8x1xf32>
    %29 = vector.broadcast %28 : vector<8x1xf32> to vector<8x128xf32>
    %30 = arith.divf %26, %29 : vector<8x128xf32>
    %c0_19 = arith.constant 0 : index
    %c0_20 = arith.constant 0 : index
    %31 = vector.load %arg8[%c0_19, %c0_20] : memref<8x128xf32, #tpu.memory_space<vmem>>, vector<8x128xf32>
    tpu.vector_store %arg8[%c0_19, %c0_20], %30 {strides = array<i32>} : memref<8x128xf32, #tpu.memory_space<vmem>>, vector<8x128xf32>,
    return
  }
  func.func @transform_0(%arg0: i32) -> (i32, i32) {
    %c0_i32 = arith.constant 0 : i32
    %c0_i32_0 = arith.constant 0 : i32
    return %arg0, %c0_i32 : i32, i32
  }
  func.func @transform_1(%arg0: i32) -> (i32, i32) {
    %c0_i32 = arith.constant 0 : i32
    %c0_i32_0 = arith.constant 0 : i32
    %c0_i32_1 = arith.constant 0 : i32
    return %c0_i32, %c0_i32_0 : i32, i32
  }
  func.func @transform_2(%arg0: i32) -> (i32, i32) {
    %c0_i32 = arith.constant 0 : i32
    %c0_i32_0 = arith.constant 0 : i32
    %c0_i32_1 = arith.constant 0 : i32
    return %c0_i32, %c0_i32_0 : i32, i32
  }
  func.func @transform_3(%arg0: i32) -> (i32, i32) {
    %c0_i32 = arith.constant 0 : i32
    %c0_i32_0 = arith.constant 0 : i32
    %c0_i32_1 = arith.constant 0 : i32
    return %c0_i32, %c0_i32_0 : i32, i32
  }
  func.func @transform_4(%arg0: i32) -> (i32, i32) {
    %c0_i32 = arith.constant 0 : i32
    %c0_i32_0 = arith.constant 0 : i32
    %c0_i32_1 = arith.constant 0 : i32
    return %c0_i32, %c0_i32_0 : i32, i32
  }
  func.func @transform_5(%arg0: i32) -> (i32, i32) {
    %c0_i32 = arith.constant 0 : i32
    %c0_i32_0 = arith.constant 0 : i32
    %c0_i32_1 = arith.constant 0 : i32
    return %c0_i32, %c0_i32_0 : i32, i32
  }
  func.func @transform_6(%arg0: i32) -> (i32, i32) {
    %c0_i32 = arith.constant 0 : i32
    %c0_i32_0 = arith.constant 0 : i32
    %c0_i32_1 = arith.constant 0 : i32
    return %c0_i32, %c0_i32_0 : i32, i32
  }
  func.func @transform_7(%arg0: i32) -> (i32, i32) {
    %c0_i32 = arith.constant 0 : i32
    %c0_i32_0 = arith.constant 0 : i32
    return %arg0, %c0_i32 : i32, i32
  }
}

</mosaic_0001>

<bundles_post_ra>
// kernel: tpu_custom_call.1
= control target key start
LH: loop header
LB: loop body
LE: loop exit
PB: predicated region body
PF: predicated region fallthrough
CT: control target
= control target key end

     0   :  { %12 = vsyncpa [#allocation3], 0  ;;  %s817_s0 = inlined_call_operand.hbm [shape: bf16[8,128], index: 0, kind: input, shape index: {}]   ;;  %s818_s1 = inlined_call_operand.hbm [shape: bf16[128,128], index: 1, kind: input, shape index: {}]   ;;  %s819_s2 = inlined_call_operand.vmem [shape: f32[1,128], index: 2, kind: input, shape index: {}]   ;;  %s820_s3 = inlined_call_operand.hbm [shape: bf16[128,128], index: 3, kind: input, shape index: {}]   ;;  %s821_s4 = inlined_call_operand.vmem [shape: f32[1,128], index: 4, kind: input, shape index: {}]   ;;  %s822_s5 = inlined_call_operand.hbm [shape: bf16[128,128], index: 5, kind: input, shape index: {}]   ;;  %s823_s6 = inlined_call_operand.vmem [shape: f32[1,128], index: 6, kind: input, shape index: {}]   ;;  %s824_s7 = inlined_call_operand.hbm [shape: f32[8,128], index: 7, kind: output, shape index: {}]  }
   0x1   :  { %13 = vsyncpa [#allocation6], 0 }
   0x2   :  { %14 = vsyncpa [#allocation9], 0 }
   0x3   :  { %15 = vsyncpa [#allocation4], 0  ;;  %s705_s24 = smov [#allocation5]  }
   0x4   :  { %s31_s25 = sshll.u32 %s705_s24, 4  ;;  %s32_s25 = int_to_ptr.vmem [resolvable:$true] %s31_s25 }
   0x5   :  { %s605_s26 = scalar_lea.vmem %s32_s25, 1024  ;;  %p610_p1 = scmp.lt.s32.totalorder %s32_s25, %s32_s25 }
   0x6   :  { %p606_p0 = scmp.ne.s32.totalorder %s32_s25, %s605_s26  ;;  %p611_p2 = scmp.lt.s32.totalorder %s605_s26, %s605_s26 }
   0x8   :  { %p612_p3 = por %p611_p2, %p610_p1 }
   0xa   :  { %p613_p4 = pnand %p612_p3, %p606_p0 }
   0xc   :  { %616 = shalt.err (!%p613_p4)
}
   0xd   :  { %s706_s27 = smov 64   ;;  %s707_s28 = smov 4  }
   0xe   :  { %37 = dma.hbm_to_vmem [thread:$0]  %s818_s1, 1024, %s32_s25, [#allocation6], %s706_s27, %s706_s27, %s707_s28  }
   0xf   :  { %s708_s8 = smov [#allocation2]   ;;  %s709_s10 = smov [#allocation7]  }
  0x10   :  { %s22_s9 = sshll.u32 %s708_s8, 4  ;;  %s45_s11 = sshll.u32 %s709_s10, 4  ;;  %s23_s9 = int_to_ptr.vmem [resolvable:$true] %s22_s9  ;;  %s46_s11 = int_to_ptr.vmem [resolvable:$true] %s45_s11 }
  0x11   :  { %s625_s12 = scalar_lea.vmem %s23_s9, 64  ;;  %p630_p6 = scmp.lt.s32.totalorder %s23_s9, %s23_s9 }
  0x12   :  { %p626_p5 = scmp.ne.s32.totalorder %s23_s9, %s625_s12  ;;  %p631_p7 = scmp.lt.s32.totalorder %s625_s12, %s625_s12 }
  0x14   :  { %p632_p8 = por %p631_p7, %p630_p6 }
  0x16   :  { %p633_p9 = pnand %p632_p8, %p626_p5 }
  0x18   :  { %636 = shalt.err (!%p633_p9)
}
  0x19   :  { %25 = dma.hbm_to_vmem [thread:$0]  %s817_s0, 64, %s23_s9, [#allocation3]  }
  0x1a   :  { %s645_s15 = scalar_lea.vmem %s46_s11, 1024  ;;  %p650_p11 = scmp.lt.s32.totalorder %s46_s11, %s46_s11 }
  0x1b   :  { %p646_p10 = scmp.ne.s32.totalorder %s46_s11, %s645_s15  ;;  %p651_p12 = scmp.lt.s32.totalorder %s645_s15, %s645_s15 }
  0x1d   :  { %p652_p13 = por %p651_p12, %p650_p11 }
  0x1f   :  { %p653_p0 = pnand %p652_p13, %p646_p10 }
  0x21   :  { %656 = shalt.err (!%p653_p0)
}
  0x22   :  { %51 = dma.hbm_to_vmem [thread:$0]  %s820_s3, 1024, %s46_s11, [#allocation6], %s706_s27, %s706_s27, %s707_s28  }
  0x23   :  { %s710_s17 = smov [#allocation8]  }
  0x24   :  { %s59_s18 = sshll.u32 %s710_s17, 4  ;;  %s60_s18 = int_to_ptr.vmem [resolvable:$true] %s59_s18 }
  0x25   :  { %s665_s19 = scalar_lea.vmem %s60_s18, 1024  ;;  %p670_p2 = scmp.lt.s32.totalorder %s60_s18, %s60_s18 }
  0x26   :  { %p666_p1 = scmp.ne.s32.totalorder %s60_s18, %s665_s19  ;;  %p671_p3 = scmp.lt.s32.totalorder %s665_s19, %s665_s19 }
  0x28   :  { %p672_p4 = por %p671_p3, %p670_p2 }
  0x2a   :  { %p673_p5 = pnand %p672_p4, %p666_p1 }
  0x2c   :  { %676 = shalt.err (!%p673_p5)
}
  0x2d   :  { %65 = dma.hbm_to_vmem [thread:$0]  %s822_s5, 1024, %s60_s18, [#allocation9], %s706_s27, %s706_s27, %s707_s28  }
  0x2e   :  { %697 = dma.done.wait [#allocation3], 64  }
  0x2f   :  { %698 = vsyncadd [#allocation3], 4294967232 }
  0x30   :  { %699 = dma.done.wait [#allocation6], 2048  }
  0x31   :  { %700 = vsyncadd [#allocation6], 4294965248 }
  0x32   :  { %701 = dma.done.wait [#allocation9], 1024  }
  0x33   :  { %702 = vsyncadd [#allocation9], 4294966272  ;;  %v711_v0 = vmov 0.0   ;;  %vm712_vm0 = vmmov 0   ;;  %v569_v1 = vld [vmem:[#allocation5 + $0x38] sm:$0xff]   ;;  %v570_v2 = vld [vmem:[#allocation5 + $0x30] sm:$0xff]  }
  0x34   :  { %500 = vmatprep.subr.bf16.mxu0 %v711_v0  ;;  %516 = vmatprep.mubr.msk.bf16.mxu0 %vm712_vm0, %v711_v0  ;;  %v571_v3 = vld [vmem:[#allocation5 + $0x28] sm:$0xff]   ;;  %v577_v4 = vld [vmem:[#allocation7 + $0x38] sm:$0xff]   ;;  %v572_v5 = vld [vmem:[#allocation5 + $0x20] sm:$0xff]  }
  0x35   :  { %520 = vmatprep.subr.bf16.mxu1 %v711_v0  ;;  %536 = vmatprep.mubr.msk.bf16.mxu1 %vm712_vm0, %v711_v0  ;;  %v578_v6 = vld [vmem:[#allocation7 + $0x30] sm:$0xff]   ;;  %v573_v7 = vld [vmem:[#allocation5 + $0x18] sm:$0xff]   ;;  %v579_v8 = vld [vmem:[#allocation7 + $0x28] sm:$0xff]  }
  0x36   :  { %501 = vmatpush3.bf16.msra.mxu0 %v569_v1  ;;  %521 = vmatpush3.bf16.msra.mxu1 %v577_v4  ;;  %v574_v9 = vld [vmem:[#allocation5 + $0x10] sm:$0xff]   ;;  %v580_v10 = vld [vmem:[#allocation7 + $0x20] sm:$0xff]   ;;  %v575_v11 = vld [vmem:[#allocation5 + $0x8] sm:$0xff]  }
  0x37   :  { %502 = vmatprep.subr.bf16.mxu0 %v711_v0  ;;  %522 = vmatprep.subr.bf16.mxu1 %v711_v0  ;;  %v581_v12 = vld [vmem:[#allocation7 + $0x18] sm:$0xff]   ;;  %v576_v13 = vld [vmem:[#allocation5] sm:$0xff]   ;;  %v582_v14 = vld [vmem:[#allocation7 + $0x10] sm:$0xff]  }
  0x38   :  { %v81_v15 = vld [vmem:[#allocation2] sm:$0xf]  ;;  %v583_v16 = vld [vmem:[#allocation7 + $0x8] sm:$0xff]   ;;  %v584_v17 = vld [vmem:[#allocation7] sm:$0xff]  }
  0x39   :  { %v585_v18 = vld [vmem:[#allocation8 + $0x38] sm:$0xff]   ;;  %v586_v19 = vld [vmem:[#allocation8 + $0x30] sm:$0xff]   ;;  %v587_v20 = vld [vmem:[#allocation8 + $0x28] sm:$0xff]  }
  0x3a   :  { %503 = vmatpush3.bf16.msra.mxu0 %v570_v2  ;;  %523 = vmatpush3.bf16.msra.mxu1 %v578_v6  ;;  %v588_v21 = vld [vmem:[#allocation8 + $0x20] sm:$0xff]   ;;  %v589_v22 = vld [vmem:[#allocation8 + $0x18] sm:$0xff]   ;;  %v590_v23 = vld [vmem:[#allocation8 + $0x10] sm:$0xff]  }
  0x3b   :  { %504 = vmatprep.subr.bf16.mxu0 %v711_v0  ;;  %524 = vmatprep.subr.bf16.mxu1 %v711_v0  ;;  %v446_v24 = vld [vmem:[%s819_s2] ss:$0 sm:$0xff]  ;;  %v591_v32 = vld [vmem:[#allocation8 + $0x8] sm:$0xff]   ;;  %v592_v33 = vld [vmem:[#allocation8] sm:$0xff]  }
  0x3c   :  { %v455_v34 = vld [vmem:[%s821_s4] ss:$0 sm:$0xff]  ;;  %s713_s4 = smov [#allocation10]  }
  0x3d   :  { %v464_v42 = vld [vmem:[%s823_s6] ss:$0 sm:$0xff]  ;;  %s435_s24 = sshll.u32 %s713_s4, 4  ;;  %s436_s24 = int_to_ptr.vmem [resolvable:$true] %s435_s24 }
  0x3e   :  { %505 = vmatpush3.bf16.msra.mxu0 %v571_v3  ;;  %525 = vmatpush3.bf16.msra.mxu1 %v579_v8  ;;  %s677_s6 = scalar_lea.vmem %s436_s24, 128  ;;  %p682_p7 = scmp.lt.s32.totalorder %s436_s24, %s436_s24 }
  0x3f   :  { %506 = vmatprep.subr.bf16.mxu0 %v711_v0  ;;  %526 = vmatprep.subr.bf16.mxu1 %v711_v0  ;;  %p678_p6 = scmp.ne.s32.totalorder %s436_s24, %s677_s6  ;;  %p683_p8 = scmp.lt.s32.totalorder %s677_s6, %s677_s6 }
  0x41   :  { %p684_p9 = por %p683_p8, %p682_p7 }
  0x42   :  { %507 = vmatpush3.bf16.msra.mxu0 %v572_v5  ;;  %527 = vmatpush3.bf16.msra.mxu1 %v580_v10 }
  0x43   :  { %508 = vmatprep.subr.bf16.mxu0 %v711_v0  ;;  %528 = vmatprep.subr.bf16.mxu1 %v711_v0  ;;  %p685_p10 = pnand %p684_p9, %p678_p6 }
  0x46   :  { %509 = vmatpush3.bf16.msra.mxu0 %v573_v7  ;;  %529 = vmatpush3.bf16.msra.mxu1 %v581_v12 }
  0x47   :  { %510 = vmatprep.subr.bf16.mxu0 %v711_v0  ;;  %530 = vmatprep.subr.bf16.mxu1 %v711_v0 }
  0x4a   :  { %511 = vmatpush3.bf16.msra.mxu0 %v574_v9  ;;  %531 = vmatpush3.bf16.msra.mxu1 %v582_v14 }
  0x4b   :  { %512 = vmatprep.subr.bf16.mxu0 %v711_v0  ;;  %532 = vmatprep.subr.bf16.mxu1 %v711_v0 }
  0x4e   :  { %513 = vmatpush3.bf16.msra.mxu0 %v575_v11  ;;  %533 = vmatpush3.bf16.msra.mxu1 %v583_v16 }
  0x4f   :  { %514 = vmatprep.subr.bf16.mxu0 %v711_v0  ;;  %534 = vmatprep.subr.bf16.mxu1 %v711_v0 }
  0x52   :  { %515 = vmatpush3.bf16.msra.mxu0 %v576_v13  ;;  %535 = vmatpush3.bf16.msra.mxu1 %v584_v17 }
  0x53   :  { %540 = vmatprep.subr.bf16.mxu0 %v711_v0 }
  0x55   :  { %517 = vmatmul.mubr.bf16.vlgmr.msra.gmra.mxu0 %v81_v15 }
  0x56   :  { %556 = vmatprep.mubr.msk.bf16.mxu0 %vm712_vm0, %v711_v0  ;;  %541 = vmatpush3.bf16.msra.mxu0 %v585_v18 }
  0x57   :  { %542 = vmatprep.subr.bf16.mxu0 %v711_v0 }
  0x5a   :  { %543 = vmatpush3.bf16.msra.mxu0 %v586_v19 }
  0x5b   :  { %544 = vmatprep.subr.bf16.mxu0 %v711_v0 }
  0x5e   :  { %545 = vmatpush3.bf16.msra.mxu0 %v587_v20 }
  0x5f   :  { %546 = vmatprep.subr.bf16.mxu0 %v711_v0 }
  0x62   :  { %547 = vmatpush3.bf16.msra.mxu0 %v588_v21 }
  0x63   :  { %548 = vmatprep.subr.bf16.mxu0 %v711_v0 }
  0x66   :  { %549 = vmatpush3.bf16.msra.mxu0 %v589_v22 }
  0x67   :  { %550 = vmatprep.subr.bf16.mxu0 %v711_v0 }
  0x6a   :  { %551 = vmatpush3.bf16.msra.mxu0 %v590_v23 }
  0x6b   :  { %552 = vmatprep.subr.bf16.mxu0 %v711_v0 }
  0x6e   :  { %553 = vmatpush3.bf16.msra.mxu0 %v591_v32 }
  0x6f   :  { %554 = vmatprep.subr.bf16.mxu0 %v711_v0 }
  0x72   :  { %555 = vmatpush3.bf16.msra.mxu0 %v592_v33 }
 0x115   :  { %v187_v25 = vpop.f32.mrf.mxu0 }
 0x116   :  { %v188_v26 = vadd.f32 %v446_v24, %v187_v25 }
 0x117   :  { %v518_v27 = vpop.f32.mrf.mxu0 }
 0x118   :  { %v193_v28 = vmax.f32 %v188_v26, 0.0 }
 0x119   :  { %v190_v29 = vpop.f32.mrf.mxu0 }
 0x11a   :  { %v194_v30 = vpack.c.bf16 %v193_v28, %v193_v28 }
 0x11b   :  { %v519_v31 = vpop.f32.mrf.mxu0 }
 0x11c   :  { %537 = vmatmul.mubr.bf16.vlgmr.msra.gmra.mxu1 %v194_v30 }
 0x1dc   :  { %v300_v35 = vpop.f32.mrf.mxu1 }
 0x1dd   :  { %v301_v36 = vadd.f32 %v455_v34, %v300_v35 }
 0x1de   :  { %v538_v37 = vpop.f32.mrf.mxu1 }
 0x1df   :  { %v306_v38 = vmax.f32 %v301_v36, 0.0 }
 0x1e0   :  { %v303_v39 = vpop.f32.mrf.mxu1 }
 0x1e1   :  { %v307_v40 = vpack.c.bf16 %v306_v38, %v306_v38 }
 0x1e2   :  { %v539_v41 = vpop.f32.mrf.mxu1 }
 0x1e3   :  { %557 = vmatmul.mubr.bf16.vlgmr.msra.gmra.mxu0 %v307_v40 }
 0x2a3   :  { %v413_v43 = vpop.f32.mrf.mxu0 }
 0x2a4   :  { %v414_v44 = vadd.f32 %v464_v42, %v413_v43 }
 0x2a5   :  { %v558_v45 = vpop.f32.mrf.mxu0 }
 0x2a6   :  { %419 = vmax.xlane.f32.xlu0 %v414_v44 }
 0x2a7   :  { %v416_v46 = vpop.f32.mrf.mxu0 }
 0x2a9   :  { %v559_v47 = vpop.f32.mrf.mxu0 }
 0x32f   :  { %v420_v48 = vpop.xlane.xlu0 %419 }
 0x330   :  { %v421_v49 = vsub.f32 %v414_v44, %v420_v48 }
 0x332   :  { %v422_v50 = vmul.f32 1.442695, %v421_v49 }
 0x334   :  { %593 = vpow2.f32 %v422_v50 }
 0x341   :  { %v594_v51 = vpop.eup %593 }
 0x342   :  { %424 = vadd.xlane.f32.xlu0 %v594_v51 }
 0x3cb   :  { %v425_v52 = vpop.xlane.xlu0 %424 }
 0x3cc   :  { %595 = vrcp.f32 %v425_v52 }
 0x3d9   :  { %v596_v53 = vpop.eup %595 }
 0x3da   :  { %v427_v54 = vmul.f32 %v596_v53, %v594_v51 }
 0x3dc   :  { %428 = vst [vmem:[#allocation10] sm:$0xff] %v427_v54 }
 0x3dd   :  { %688 = shalt.err (!%p685_p10)
}
 0x3de   :  { %438 = dma.vmem_to_hbm [thread:$0]  %s436_s24, 128, %s824_s7, [#allocation4]  }
 0x3df   :  { %703 = dma.done.wait [#allocation4], 128  }
 0x3e0   :  { %704 = vsyncadd [#allocation4], 4294967168 }
 0x3e1   :  { %442 = vsyncpa [#allocation3], 1 }
 0x3e2   :  { %443 = vsyncpa [#allocation6], 1 }
 0x3e3   :  { %444 = vsyncpa [#allocation9], 1 }
 0x3e4   :  { %445 = vsyncpa [#allocation4], 1 }

// kernel: tpu_custom_call.1
= control target key start
LH: loop header
LB: loop body
LE: loop exit
PB: predicated region body
PF: predicated region fallthrough
CT: control target
= control target key end

     0   :  { %12 = vsyncpa [#allocation3], 0  ;;  %s817_s0 = inlined_call_operand.hbm [shape: bf16[8,128], index: 0, kind: input, shape index: {}]   ;;  %s818_s1 = inlined_call_operand.hbm [shape: bf16[128,128], index: 1, kind: input, shape index: {}]   ;;  %s819_s2 = inlined_call_operand.vmem [shape: f32[1,128], index: 2, kind: input, shape index: {}]   ;;  %s820_s3 = inlined_call_operand.hbm [shape: bf16[128,128], index: 3, kind: input, shape index: {}]   ;;  %s821_s4 = inlined_call_operand.vmem [shape: f32[1,128], index: 4, kind: input, shape index: {}]   ;;  %s822_s5 = inlined_call_operand.hbm [shape: bf16[128,128], index: 5, kind: input, shape index: {}]   ;;  %s823_s6 = inlined_call_operand.vmem [shape: f32[1,128], index: 6, kind: input, shape index: {}]   ;;  %s824_s7 = inlined_call_operand.hbm [shape: f32[8,128], index: 7, kind: output, shape index: {}]  }
   0x1   :  { %13 = vsyncpa [#allocation6], 0 }
   0x2   :  { %14 = vsyncpa [#allocation9], 0 }
   0x3   :  { %15 = vsyncpa [#allocation4], 0  ;;  %s705_s24 = smov [#allocation5]  }
   0x4   :  { %s31_s25 = sshll.u32 %s705_s24, 4  ;;  %s32_s25 = int_to_ptr.vmem [resolvable:$true] %s31_s25 }
   0x5   :  { %s605_s26 = scalar_lea.vmem %s32_s25, 1024  ;;  %p610_p1 = scmp.lt.s32.totalorder %s32_s25, %s32_s25 }
   0x6   :  { %p606_p0 = scmp.ne.s32.totalorder %s32_s25, %s605_s26  ;;  %p611_p2 = scmp.lt.s32.totalorder %s605_s26, %s605_s26 }
   0x8   :  { %p612_p3 = por %p611_p2, %p610_p1 }
   0xa   :  { %p613_p4 = pnand %p612_p3, %p606_p0 }
   0xc   :  { %616 = shalt.err (!%p613_p4)
}
   0xd   :  { %s706_s27 = smov 64   ;;  %s707_s28 = smov 4  }
   0xe   :  { %37 = dma.hbm_to_vmem [thread:$0]  %s818_s1, 1024, %s32_s25, [#allocation6], %s706_s27, %s706_s27, %s707_s28  }
   0xf   :  { %s708_s8 = smov [#allocation2]   ;;  %s709_s10 = smov [#allocation7]  }
  0x10   :  { %s22_s9 = sshll.u32 %s708_s8, 4  ;;  %s45_s11 = sshll.u32 %s709_s10, 4  ;;  %s23_s9 = int_to_ptr.vmem [resolvable:$true] %s22_s9  ;;  %s46_s11 = int_to_ptr.vmem [resolvable:$true] %s45_s11 }
  0x11   :  { %s625_s12 = scalar_lea.vmem %s23_s9, 64  ;;  %p630_p6 = scmp.lt.s32.totalorder %s23_s9, %s23_s9 }
  0x12   :  { %p626_p5 = scmp.ne.s32.totalorder %s23_s9, %s625_s12  ;;  %p631_p7 = scmp.lt.s32.totalorder %s625_s12, %s625_s12 }
  0x14   :  { %p632_p8 = por %p631_p7, %p630_p6 }
  0x16   :  { %p633_p9 = pnand %p632_p8, %p626_p5 }
  0x18   :  { %636 = shalt.err (!%p633_p9)
}
  0x19   :  { %25 = dma.hbm_to_vmem [thread:$0]  %s817_s0, 64, %s23_s9, [#allocation3]  }
  0x1a   :  { %s645_s15 = scalar_lea.vmem %s46_s11, 1024  ;;  %p650_p11 = scmp.lt.s32.totalorder %s46_s11, %s46_s11 }
  0x1b   :  { %p646_p10 = scmp.ne.s32.totalorder %s46_s11, %s645_s15  ;;  %p651_p12 = scmp.lt.s32.totalorder %s645_s15, %s645_s15 }
  0x1d   :  { %p652_p13 = por %p651_p12, %p650_p11 }
  0x1f   :  { %p653_p0 = pnand %p652_p13, %p646_p10 }
  0x21   :  { %656 = shalt.err (!%p653_p0)
}
  0x22   :  { %51 = dma.hbm_to_vmem [thread:$0]  %s820_s3, 1024, %s46_s11, [#allocation6], %s706_s27, %s706_s27, %s707_s28  }
  0x23   :  { %s710_s17 = smov [#allocation8]  }
  0x24   :  { %s59_s18 = sshll.u32 %s710_s17, 4  ;;  %s60_s18 = int_to_ptr.vmem [resolvable:$true] %s59_s18 }
  0x25   :  { %s665_s19 = scalar_lea.vmem %s60_s18, 1024  ;;  %p670_p2 = scmp.lt.s32.totalorder %s60_s18, %s60_s18 }
  0x26   :  { %p666_p1 = scmp.ne.s32.totalorder %s60_s18, %s665_s19  ;;  %p671_p3 = scmp.lt.s32.totalorder %s665_s19, %s665_s19 }
  0x28   :  { %p672_p4 = por %p671_p3, %p670_p2 }
  0x2a   :  { %p673_p5 = pnand %p672_p4, %p666_p1 }
  0x2c   :  { %676 = shalt.err (!%p673_p5)
}
  0x2d   :  { %65 = dma.hbm_to_vmem [thread:$0]  %s822_s5, 1024, %s60_s18, [#allocation9], %s706_s27, %s706_s27, %s707_s28  }
  0x2e   :  { %697 = dma.done.wait [#allocation3], 64  }
  0x2f   :  { %698 = vsyncadd [#allocation3], 4294967232 }
  0x30   :  { %699 = dma.done.wait [#allocation6], 2048  }
  0x31   :  { %700 = vsyncadd [#allocation6], 4294965248 }
  0x32   :  { %701 = dma.done.wait [#allocation9], 1024  }
  0x33   :  { %702 = vsyncadd [#allocation9], 4294966272  ;;  %v711_v0 = vmov 0.0   ;;  %vm712_vm0 = vmmov 0   ;;  %v569_v1 = vld [vmem:[#allocation5 + $0x38] sm:$0xff]   ;;  %v570_v2 = vld [vmem:[#allocation5 + $0x30] sm:$0xff]  }
  0x34   :  { %500 = vmatprep.subr.bf16.mxu0 %v711_v0  ;;  %516 = vmatprep.mubr.msk.bf16.mxu0 %vm712_vm0, %v711_v0  ;;  %v571_v3 = vld [vmem:[#allocation5 + $0x28] sm:$0xff]   ;;  %v577_v4 = vld [vmem:[#allocation7 + $0x38] sm:$0xff]   ;;  %v572_v5 = vld [vmem:[#allocation5 + $0x20] sm:$0xff]  }
  0x35   :  { %520 = vmatprep.subr.bf16.mxu1 %v711_v0  ;;  %536 = vmatprep.mubr.msk.bf16.mxu1 %vm712_vm0, %v711_v0  ;;  %v578_v6 = vld [vmem:[#allocation7 + $0x30] sm:$0xff]   ;;  %v573_v7 = vld [vmem:[#allocation5 + $0x18] sm:$0xff]   ;;  %v579_v8 = vld [vmem:[#allocation7 + $0x28] sm:$0xff]  }
  0x36   :  { %501 = vmatpush3.bf16.msra.mxu0 %v569_v1  ;;  %521 = vmatpush3.bf16.msra.mxu1 %v577_v4  ;;  %v574_v9 = vld [vmem:[#allocation5 + $0x10] sm:$0xff]   ;;  %v580_v10 = vld [vmem:[#allocation7 + $0x20] sm:$0xff]   ;;  %v575_v11 = vld [vmem:[#allocation5 + $0x8] sm:$0xff]  }
  0x37   :  { %502 = vmatprep.subr.bf16.mxu0 %v711_v0  ;;  %522 = vmatprep.subr.bf16.mxu1 %v711_v0  ;;  %v581_v12 = vld [vmem:[#allocation7 + $0x18] sm:$0xff]   ;;  %v576_v13 = vld [vmem:[#allocation5] sm:$0xff]   ;;  %v582_v14 = vld [vmem:[#allocation7 + $0x10] sm:$0xff]  }
  0x38   :  { %v81_v15 = vld [vmem:[#allocation2] sm:$0xf]  ;;  %v583_v16 = vld [vmem:[#allocation7 + $0x8] sm:$0xff]   ;;  %v584_v17 = vld [vmem:[#allocation7] sm:$0xff]  }
  0x39   :  { %v585_v18 = vld [vmem:[#allocation8 + $0x38] sm:$0xff]   ;;  %v586_v19 = vld [vmem:[#allocation8 + $0x30] sm:$0xff]   ;;  %v587_v20 = vld [vmem:[#allocation8 + $0x28] sm:$0xff]  }
  0x3a   :  { %503 = vmatpush3.bf16.msra.mxu0 %v570_v2  ;;  %523 = vmatpush3.bf16.msra.mxu1 %v578_v6  ;;  %v588_v21 = vld [vmem:[#allocation8 + $0x20] sm:$0xff]   ;;  %v589_v22 = vld [vmem:[#allocation8 + $0x18] sm:$0xff]   ;;  %v590_v23 = vld [vmem:[#allocation8 + $0x10] sm:$0xff]  }
  0x3b   :  { %504 = vmatprep.subr.bf16.mxu0 %v711_v0  ;;  %524 = vmatprep.subr.bf16.mxu1 %v711_v0  ;;  %v446_v24 = vld [vmem:[%s819_s2] ss:$0 sm:$0xff]  ;;  %v591_v32 = vld [vmem:[#allocation8 + $0x8] sm:$0xff]   ;;  %v592_v33 = vld [vmem:[#allocation8] sm:$0xff]  }
  0x3c   :  { %v455_v34 = vld [vmem:[%s821_s4] ss:$0 sm:$0xff]  ;;  %s713_s4 = smov [#allocation10]  }
  0x3d   :  { %v464_v42 = vld [vmem:[%s823_s6] ss:$0 sm:$0xff]  ;;  %s435_s24 = sshll.u32 %s713_s4, 4  ;;  %s436_s24 = int_to_ptr.vmem [resolvable:$true] %s435_s24 }
  0x3e   :  { %505 = vmatpush3.bf16.msra.mxu0 %v571_v3  ;;  %525 = vmatpush3.bf16.msra.mxu1 %v579_v8  ;;  %s677_s6 = scalar_lea.vmem %s436_s24, 128  ;;  %p682_p7 = scmp.lt.s32.totalorder %s436_s24, %s436_s24 }
  0x3f   :  { %506 = vmatprep.subr.bf16.mxu0 %v711_v0  ;;  %526 = vmatprep.subr.bf16.mxu1 %v711_v0  ;;  %p678_p6 = scmp.ne.s32.totalorder %s436_s24, %s677_s6  ;;  %p683_p8 = scmp.lt.s32.totalorder %s677_s6, %s677_s6 }
  0x41   :  { %p684_p9 = por %p683_p8, %p682_p7 }
  0x42   :  { %507 = vmatpush3.bf16.msra.mxu0 %v572_v5  ;;  %527 = vmatpush3.bf16.msra.mxu1 %v580_v10 }
  0x43   :  { %508 = vmatprep.subr.bf16.mxu0 %v711_v0  ;;  %528 = vmatprep.subr.bf16.mxu1 %v711_v0  ;;  %p685_p10 = pnand %p684_p9, %p678_p6 }
  0x46   :  { %509 = vmatpush3.bf16.msra.mxu0 %v573_v7  ;;  %529 = vmatpush3.bf16.msra.mxu1 %v581_v12 }
  0x47   :  { %510 = vmatprep.subr.bf16.mxu0 %v711_v0  ;;  %530 = vmatprep.subr.bf16.mxu1 %v711_v0 }
  0x4a   :  { %511 = vmatpush3.bf16.msra.mxu0 %v574_v9  ;;  %531 = vmatpush3.bf16.msra.mxu1 %v582_v14 }
  0x4b   :  { %512 = vmatprep.subr.bf16.mxu0 %v711_v0  ;;  %532 = vmatprep.subr.bf16.mxu1 %v711_v0 }
  0x4e   :  { %513 = vmatpush3.bf16.msra.mxu0 %v575_v11  ;;  %533 = vmatpush3.bf16.msra.mxu1 %v583_v16 }
  0x4f   :  { %514 = vmatprep.subr.bf16.mxu0 %v711_v0  ;;  %534 = vmatprep.subr.bf16.mxu1 %v711_v0 }
  0x52   :  { %515 = vmatpush3.bf16.msra.mxu0 %v576_v13  ;;  %535 = vmatpush3.bf16.msra.mxu1 %v584_v17 }
  0x53   :  { %540 = vmatprep.subr.bf16.mxu0 %v711_v0 }
  0x55   :  { %517 = vmatmul.mubr.bf16.vlgmr.msra.gmra.mxu0 %v81_v15 }
  0x56   :  { %556 = vmatprep.mubr.msk.bf16.mxu0 %vm712_vm0, %v711_v0  ;;  %541 = vmatpush3.bf16.msra.mxu0 %v585_v18 }
  0x57   :  { %542 = vmatprep.subr.bf16.mxu0 %v711_v0 }
  0x5a   :  { %543 = vmatpush3.bf16.msra.mxu0 %v586_v19 }
  0x5b   :  { %544 = vmatprep.subr.bf16.mxu0 %v711_v0 }
  0x5e   :  { %545 = vmatpush3.bf16.msra.mxu0 %v587_v20 }
  0x5f   :  { %546 = vmatprep.subr.bf16.mxu0 %v711_v0 }
  0x62   :  { %547 = vmatpush3.bf16.msra.mxu0 %v588_v21 }
  0x63   :  { %548 = vmatprep.subr.bf16.mxu0 %v711_v0 }
  0x66   :  { %549 = vmatpush3.bf16.msra.mxu0 %v589_v22 }
  0x67   :  { %550 = vmatprep.subr.bf16.mxu0 %v711_v0 }
  0x6a   :  { %551 = vmatpush3.bf16.msra.mxu0 %v590_v23 }
  0x6b   :  { %552 = vmatprep.subr.bf16.mxu0 %v711_v0 }
  0x6e   :  { %553 = vmatpush3.bf16.msra.mxu0 %v591_v32 }
  0x6f   :  { %554 = vmatprep.subr.bf16.mxu0 %v711_v0 }
  0x72   :  { %555 = vmatpush3.bf16.msra.mxu0 %v592_v33 }
 0x115   :  { %v187_v25 = vpop.f32.mrf.mxu0 }
 0x116   :  { %v188_v26 = vadd.f32 %v446_v24, %v187_v25 }
 0x117   :  { %v518_v27 = vpop.f32.mrf.mxu0 }
 0x118   :  { %v193_v28 = vmax.f32 %v188_v26, 0.0 }
 0x119   :  { %v190_v29 = vpop.f32.mrf.mxu0 }
 0x11a   :  { %v194_v30 = vpack.c.bf16 %v193_v28, %v193_v28 }
 0x11b   :  { %v519_v31 = vpop.f32.mrf.mxu0 }
 0x11c   :  { %537 = vmatmul.mubr.bf16.vlgmr.msra.gmra.mxu1 %v194_v30 }
 0x1dc   :  { %v300_v35 = vpop.f32.mrf.mxu1 }
 0x1dd   :  { %v301_v36 = vadd.f32 %v455_v34, %v300_v35 }
 0x1de   :  { %v538_v37 = vpop.f32.mrf.mxu1 }
 0x1df   :  { %v306_v38 = vmax.f32 %v301_v36, 0.0 }
 0x1e0   :  { %v303_v39 = vpop.f32.mrf.mxu1 }
 0x1e1   :  { %v307_v40 = vpack.c.bf16 %v306_v38, %v306_v38 }
 0x1e2   :  { %v539_v41 = vpop.f32.mrf.mxu1 }
 0x1e3   :  { %557 = vmatmul.mubr.bf16.vlgmr.msra.gmra.mxu0 %v307_v40 }
 0x2a3   :  { %v413_v43 = vpop.f32.mrf.mxu0 }
 0x2a4   :  { %v414_v44 = vadd.f32 %v464_v42, %v413_v43 }
 0x2a5   :  { %v558_v45 = vpop.f32.mrf.mxu0 }
 0x2a6   :  { %419 = vmax.xlane.f32.xlu0 %v414_v44 }
 0x2a7   :  { %v416_v46 = vpop.f32.mrf.mxu0 }
 0x2a9   :  { %v559_v47 = vpop.f32.mrf.mxu0 }
 0x32f   :  { %v420_v48 = vpop.xlane.xlu0 %419 }
 0x330   :  { %v421_v49 = vsub.f32 %v414_v44, %v420_v48 }
 0x332   :  { %v422_v50 = vmul.f32 1.442695, %v421_v49 }
 0x334   :  { %593 = vpow2.f32 %v422_v50 }
 0x341   :  { %v594_v51 = vpop.eup %593 }
 0x342   :  { %424 = vadd.xlane.f32.xlu0 %v594_v51 }
 0x3cb   :  { %v425_v52 = vpop.xlane.xlu0 %424 }
 0x3cc   :  { %595 = vrcp.f32 %v425_v52 }
 0x3d9   :  { %v596_v53 = vpop.eup %595 }
 0x3da   :  { %v427_v54 = vmul.f32 %v596_v53, %v594_v51 }
 0x3dc   :  { %428 = vst [vmem:[#allocation10] sm:$0xff] %v427_v54 }
 0x3dd   :  { %688 = shalt.err (!%p685_p10)
}
 0x3de   :  { %438 = dma.vmem_to_hbm [thread:$0]  %s436_s24, 128, %s824_s7, [#allocation4]  }
 0x3df   :  { %703 = dma.done.wait [#allocation4], 128  }
 0x3e0   :  { %704 = vsyncadd [#allocation4], 4294967168 }
 0x3e1   :  { %442 = vsyncpa [#allocation3], 1 }
 0x3e2   :  { %443 = vsyncpa [#allocation6], 1 }
 0x3e3   :  { %444 = vsyncpa [#allocation9], 1 }
 0x3e4   :  { %445 = vsyncpa [#allocation4], 1 }

</bundles_post_ra>
